<compile_context>
chip_gen: v5e
topology: v5e:2x2
jax: 0.10.0
libtpu: 0.0.40
codegen_flags: <defaults>
</compile_context>

<pallas_src>
import jax
import jax.numpy as jnp
from jax.experimental import pallas as pl
from jax.experimental.pallas import tpu as pltpu


_LOGITS_BLOCK_BUDGET = 4 << 20   # ~4 MB of logits per grid step (perf review)


def _make_dice_kernel(hw, tile_hw, mask_tail):
    def kernel(logits_ref, labels_ref, yvol_ref, pvol_ref, inter_ref):
        x = logits_ref[...].astype(jnp.float32)      # (C, tile_hw): class on sublanes
        labels = labels_ref[...].astype(jnp.int32)   # (1, tile_hw): lane-dense ids

        # softmax over the class (sublane) axis == nn.Softmax(dim=1) on NCHW
        m = jnp.max(x, axis=0, keepdims=True)        # (1, tile_hw)
        e = jnp.exp(x - m)                           # (C, tile_hw)
        s = jnp.sum(e, axis=0, keepdims=True)        # (1, tile_hw)
        inv = 1.0 / s                                # hoisted: one divide row, not C
        p = e * inv                                  # (C, tile_hw) softmax probs

        if mask_tail:
            # Last spatial block may overhang H*W: zero its contribution.
            t = pl.program_id(1)
            pos = t * tile_hw + jax.lax.broadcasted_iota(jnp.int32, (1, tile_hw), 1)
            valid = pos < hw                         # (1, tile_hw)
            labels = jnp.where(valid, labels, -1)    # no class id matches -1
            p = jnp.where(valid, p, 0.0)             # select: NaN-safe vs. garbage

        # one-hot soft label (get_soft_label): compare against sublane class iota
        cls_ids = jax.lax.broadcasted_iota(jnp.int32, x.shape, 0)
        onehot = (labels == cls_ids).astype(jnp.float32)      # (C, tile_hw)

        # per-class partial sums for this chunk -> (C, 1) outputs
        yvol_ref[...] = jnp.sum(onehot, axis=1, keepdims=True)
        pvol_ref[...] = jnp.sum(p, axis=1, keepdims=True)
        inter_ref[...] = jnp.sum(onehot * p, axis=1, keepdims=True)

    return kernel


def dice_loss(predict, labels, cls_num, tile_hw=None):
    """predict: [B, C, H, W] float logits; labels: [B, H, W] integer class ids."""
    B, C, H, W = predict.shape
    assert C == cls_num
    HW = H * W

    # Free views only: NCHW stays resident in HBM (no transpose, no dtype pass).
    logits3 = predict.reshape(B, C, HW)
    if jnp.issubdtype(labels.dtype, jnp.integer) and labels.dtype.itemsize <= 4:
        labels3 = labels.reshape(B, 1, HW)           # pass through at native width
    else:
        labels3 = labels.reshape(B, 1, HW).astype(jnp.int32)

    if tile_hw is None:
        # Largest tile whose logits block fits the VMEM budget.
        max_tile = max(
            128, (_LOGITS_BLOCK_BUDGET // (C * predict.dtype.itemsize)) // 128 * 128)
        if HW <= max_tile:
            tile_hw = HW                             # whole spatial extent per item
        else:
            # Prefer the largest 128-aligned divisor of HW within budget (no tail).
            tile_hw = 0
            cand = max_tile
            while cand >= 128:
                if HW % cand == 0:
                    tile_hw = cand
                    break
                cand -= 128
            # Degenerate / no divisor: full-budget tile + masked tail block.
            if tile_hw * 4 < max_tile:
                tile_hw = max_tile

    num_t = pl.cdiv(HW, tile_hw)
    mask_tail = (HW % tile_hw) != 0
    grid = (B, num_t)

    kernel = _make_dice_kernel(HW, tile_hw, mask_tail)

    part_shape = jax.ShapeDtypeStruct((B, num_t, C, 1), jnp.float32)
    part_spec = pl.BlockSpec((None, None, C, 1), lambda b, t: (b, t, 0, 0))

    # VMEM budget: double-buffered logits + labels blocks, plus headroom.
    block_bytes = C * tile_hw * predict.dtype.itemsize + tile_hw * labels3.dtype.itemsize
    vmem_limit = int(min(max(2 * block_bytes + (2 << 20), 16 << 20), 48 << 20))

    y_parts, p_parts, i_parts = pl.pallas_call(
        kernel,
        out_shape=(part_shape, part_shape, part_shape),
        grid=grid,
        in_specs=[
            # read NCHW directly as (C, tile_hw) blocks (batch dim squeezed)
            pl.BlockSpec((None, C, tile_hw), lambda b, t: (b, 0, t)),
            # lane-dense label block (1, tile_hw)
            pl.BlockSpec((None, 1, tile_hw), lambda b, t: (b, 0, t)),
        ],
        out_specs=(part_spec, part_spec, part_spec),
        compiler_params=pltpu.CompilerParams(
            # both axes independent: v7x megacore can split chunks across cores
            dimension_semantics=("parallel", "parallel"),
            vmem_limit_bytes=vmem_limit,
        ),
    )(logits3, labels3)

    # Tiny finalize outside the kernel (cheap; also tree-sum precision).
    y_vol = jnp.sum(y_parts, axis=(0, 1))[:, 0]      # (C,)
    p_vol = jnp.sum(p_parts, axis=(0, 1))[:, 0]
    inter = jnp.sum(i_parts, axis=(0, 1))[:, 0]
    dice = (2.0 * inter + 1e-05) / (y_vol + p_vol + 1e-05)
    return 1.0 - jnp.mean(dice)


def _reference(predict, labels, cls_num):
    """Pure-JAX reference mirroring the PyTorch DiceLoss module."""
    B, C, H, W = predict.shape
    p = jax.nn.softmax(predict.astype(jnp.float32), axis=1)
    p2 = jnp.transpose(p, (0, 2, 3, 1)).reshape(-1, C)
    y2 = jax.nn.one_hot(labels.reshape(-1), C, dtype=jnp.float32)
    y_vol = jnp.sum(y2, axis=0)
    p_vol = jnp.sum(p2, axis=0)
    inter = jnp.sum(y2 * p2, axis=0)
    dice = (2.0 * inter + 1e-05) / (y_vol + p_vol + 1e-05)
    return 1.0 - jnp.mean(dice)


if __name__ == "__main__":
    key = jax.random.PRNGKey(0)
    k1, k2 = jax.random.split(key)
    B, C, H, W = 2, 4, 16, 16
    predict = jax.random.normal(k1, (B, C, H, W), dtype=jnp.float32)
    labels = jax.random.randint(k2, (B, H, W), 0, C, dtype=jnp.int32)

    # 1) default tiling: whole H*W per batch item (single chunk per item)
    loss = dice_loss(predict, labels, cls_num=C)
    loss = jax.block_until_ready(loss)
    ref = _reference(predict, labels, cls_num=C)
    assert jnp.allclose(loss, ref, atol=1e-4, rtol=1e-4), (loss, ref)

    # 2) multi-chunk path: forces several spatial tiles and the parallel
    #    per-chunk partial-sum combine in the wrapper.
    loss2 = dice_loss(predict, labels, cls_num=C, tile_hw=128)
    loss2 = jax.block_until_ready(loss2)
    assert jnp.allclose(loss2, ref, atol=1e-4, rtol=1e-4), (loss2, ref)

    print("KERNEL_OK")
</pallas_src>

<mosaic_0001>
module attributes {stable_mosaic.version = 11 : i64} {
  func.func @kernel(%arg0: i32, %arg1: i32, %arg2: memref<1x4x256xf32, #tpu.memory_space<vmem>>, %arg3: memref<1x1x256xi32, #tpu.memory_space<vmem>>, %arg4: memref<1x1x4x1xf32, #tpu.memory_space<vmem>>, %arg5: memref<1x1x4x1xf32, #tpu.memory_space<vmem>>, %arg6: memref<1x1x4x1xf32, #tpu.memory_space<vmem>>) attributes {dimension_semantics = [#tpu.dimension_semantics<parallel>, #tpu.dimension_semantics<parallel>], iteration_bounds = array<i64: 2, 1>, scalar_prefetch = 0 : i64, scratch_operands = 0 : i64, tpu.core_type = #tpu.core_type<tc>, window_params = [{transform_indices = @transform_0, window_bounds = array<i64: 1, 4, 256>}, {transform_indices = @transform_1, window_bounds = array<i64: 1, 1, 256>}, {transform_indices = @transform_2, window_bounds = array<i64: 1, 1, 4, 1>}, {transform_indices = @transform_3, window_bounds = array<i64: 1, 1, 4, 1>}, {transform_indices = @transform_4, window_bounds = array<i64: 1, 1, 4, 1>}]} {
    %c0 = arith.constant 0 : index
    %c0_0 = arith.constant 0 : index
    %c0_1 = arith.constant 0 : index
    %0 = vector.load %arg2[%c0, %c0_0, %c0_1] : memref<1x4x256xf32, #tpu.memory_space<vmem>>, vector<1x4x256xf32>
    %1 = vector.shape_cast %0 : vector<1x4x256xf32> to vector<4x256xf32>
    %c0_2 = arith.constant 0 : index
    %c0_3 = arith.constant 0 : index
    %c0_4 = arith.constant 0 : index
    %2 = vector.load %arg3[%c0_2, %c0_3, %c0_4] : memref<1x1x256xi32, #tpu.memory_space<vmem>>, vector<1x1x256xi32>
    %3 = vector.shape_cast %2 : vector<1x1x256xi32> to vector<1x256xi32>
    %cst = arith.constant dense<0xFF800000> : vector<256xf32>
    %4 = vector.multi_reduction <maximumf>, %1, %cst [0] : vector<4x256xf32> to vector<256xf32>
    %5 = vector.shape_cast %4 : vector<256xf32> to vector<1x256xf32>
    %6 = vector.broadcast %5 : vector<1x256xf32> to vector<4x256xf32>
    %7 = arith.subf %1, %6 : vector<4x256xf32>
    %8 = math.exp %7 : vector<4x256xf32>
    %cst_5 = arith.constant dense<0.000000e+00> : vector<256xf32>
    %9 = vector.multi_reduction <add>, %8, %cst_5 [0] : vector<4x256xf32> to vector<256xf32>
    %10 = vector.shape_cast %9 : vector<256xf32> to vector<1x256xf32>
    %cst_6 = arith.constant 1.000000e+00 : f32
    %11 = vector.broadcast %cst_6 : f32 to vector<1x256xf32>
    %12 = arith.divf %11, %10 : vector<1x256xf32>
    %13 = vector.broadcast %12 : vector<1x256xf32> to vector<4x256xf32>
    %14 = arith.mulf %8, %13 : vector<4x256xf32>
    %15 = tpu.iota {dimensions = array<i32: 0>} : vector<4x256xi32>
    %16 = vector.broadcast %3 : vector<1x256xi32> to vector<4x256xi32>
    %17 = arith.cmpi eq, %16, %15 : vector<4x256xi32>
    %18 = arith.extui %17 : vector<4x256xi1> to vector<4x256xi32>
    %19 = arith.sitofp %18 : vector<4x256xi32> to vector<4x256xf32>
    %cst_7 = arith.constant dense<0.000000e+00> : vector<4xf32>
    %20 = vector.multi_reduction <add>, %19, %cst_7 [1] : vector<4x256xf32> to vector<4xf32>
    %21 = vector.shape_cast %20 : vector<4xf32> to vector<4x1xf32>
    %c0_8 = arith.constant 0 : index
    %c0_9 = arith.constant 0 : index
    %c0_10 = arith.constant 0 : index
    %c0_11 = arith.constant 0 : index
    %22 = vector.load %arg4[%c0_8, %c0_9, %c0_10, %c0_11] : memref<1x1x4x1xf32, #tpu.memory_space<vmem>>, vector<1x1x4x1xf32>
    %23 = vector.shape_cast %22 : vector<1x1x4x1xf32> to vector<4x1xf32>
    %24 = vector.shape_cast %21 : vector<4x1xf32> to vector<1x1x4x1xf32>
    tpu.vector_store %arg4[%c0_8, %c0_9, %c0_10, %c0_11], %24 {strides = array<i32>} : memref<1x1x4x1xf32, #tpu.memory_space<vmem>>, vector<1x1x4x1xf32>,
    %cst_12 = arith.constant dense<0.000000e+00> : vector<4xf32>
    %25 = vector.multi_reduction <add>, %14, %cst_12 [1] : vector<4x256xf32> to vector<4xf32>
    %26 = vector.shape_cast %25 : vector<4xf32> to vector<4x1xf32>
    %c0_13 = arith.constant 0 : index
    %c0_14 = arith.constant 0 : index
    %c0_15 = arith.constant 0 : index
    %c0_16 = arith.constant 0 : index
    %27 = vector.load %arg5[%c0_13, %c0_14, %c0_15, %c0_16] : memref<1x1x4x1xf32, #tpu.memory_space<vmem>>, vector<1x1x4x1xf32>
    %28 = vector.shape_cast %27 : vector<1x1x4x1xf32> to vector<4x1xf32>
    %29 = vector.shape_cast %26 : vector<4x1xf32> to vector<1x1x4x1xf32>
    tpu.vector_store %arg5[%c0_13, %c0_14, %c0_15, %c0_16], %29 {strides = array<i32>} : memref<1x1x4x1xf32, #tpu.memory_space<vmem>>, vector<1x1x4x1xf32>,
    %30 = arith.mulf %19, %14 : vector<4x256xf32>
    %cst_17 = arith.constant dense<0.000000e+00> : vector<4xf32>
    %31 = vector.multi_reduction <add>, %30, %cst_17 [1] : vector<4x256xf32> to vector<4xf32>
    %32 = vector.shape_cast %31 : vector<4xf32> to vector<4x1xf32>
    %c0_18 = arith.constant 0 : index
    %c0_19 = arith.constant 0 : index
    %c0_20 = arith.constant 0 : index
    %c0_21 = arith.constant 0 : index
    %33 = vector.load %arg6[%c0_18, %c0_19, %c0_20, %c0_21] : memref<1x1x4x1xf32, #tpu.memory_space<vmem>>, vector<1x1x4x1xf32>
    %34 = vector.shape_cast %33 : vector<1x1x4x1xf32> to vector<4x1xf32>
    %35 = vector.shape_cast %32 : vector<4x1xf32> to vector<1x1x4x1xf32>
    tpu.vector_store %arg6[%c0_18, %c0_19, %c0_20, %c0_21], %35 {strides = array<i32>} : memref<1x1x4x1xf32, #tpu.memory_space<vmem>>, vector<1x1x4x1xf32>,
    return
  }
  func.func @transform_0(%arg0: i32, %arg1: i32) -> (i32, i32, i32) {
    %c0_i32 = arith.constant 0 : i32
    %c0_i32_0 = arith.constant 0 : i32
    return %arg0, %c0_i32, %arg1 : i32, i32, i32
  }
  func.func @transform_1(%arg0: i32, %arg1: i32) -> (i32, i32, i32) {
    %c0_i32 = arith.constant 0 : i32
    %c0_i32_0 = arith.constant 0 : i32
    return %arg0, %c0_i32, %arg1 : i32, i32, i32
  }
  func.func @transform_2(%arg0: i32, %arg1: i32) -> (i32, i32, i32, i32) {
    %c0_i32 = arith.constant 0 : i32
    %c0_i32_0 = arith.constant 0 : i32
    %c0_i32_1 = arith.constant 0 : i32
    return %arg0, %arg1, %c0_i32, %c0_i32_0 : i32, i32, i32, i32
  }
  func.func @transform_3(%arg0: i32, %arg1: i32) -> (i32, i32, i32, i32) {
    %c0_i32 = arith.constant 0 : i32
    %c0_i32_0 = arith.constant 0 : i32
    %c0_i32_1 = arith.constant 0 : i32
    return %arg0, %arg1, %c0_i32, %c0_i32_0 : i32, i32, i32, i32
  }
  func.func @transform_4(%arg0: i32, %arg1: i32) -> (i32, i32, i32, i32) {
    %c0_i32 = arith.constant 0 : i32
    %c0_i32_0 = arith.constant 0 : i32
    %c0_i32_1 = arith.constant 0 : i32
    return %arg0, %arg1, %c0_i32, %c0_i32_0 : i32, i32, i32, i32
  }
}

</mosaic_0001>

<bundles_post_ra>
// kernel: tpu_custom_call.1
= control target key start
LH: loop header
LB: loop body
LE: loop exit
PB: predicated region body
PF: predicated region fallthrough
CT: control target
= control target key end

     0   :  { %10 = vsyncpa [#allocation3], 0  ;;  %s1003_s0 = inlined_call_operand.hbm [shape: f32[2,4,256], index: 0, kind: input, shape index: {}]   ;;  %s1004_s1 = inlined_call_operand.hbm [shape: s32[2,1,256], index: 1, kind: input, shape index: {}]   ;;  %s1005_s2 = inlined_call_operand.vmem [shape: f32[2,1,4,1], index: 2, kind: output, shape index: {0}]   ;;  %s1006_s3 = inlined_call_operand.vmem [shape: f32[2,1,4,1], index: 3, kind: output, shape index: {1}]   ;;  %s1007_s4 = inlined_call_operand.vmem [shape: f32[2,1,4,1], index: 4, kind: output, shape index: {2}]  }
   0x1   :  { %12 = vsyncpa [#allocation3 + $0x1], 0 }
   0x2   :  { %13 = vsyncpa [#allocation5], 0 }
   0x3   :  { %15 = vsyncpa [#allocation5 + $0x1], 0  ;;  %s873_s15 = smov 0   ;;  %s875_s16 = smov 0  }
   0x4   :  { %s877_s17 = smov 0   ;;  %s879_s18 = smov 0  }
   0x5   :  { %s881_s19 = smov 0   ;;  %s883_s20 = smov 0  }
   0x6 LB: > { %s644_s21 = sadd.s32 4294967295, %s845_s20   ;;  %s33_s22 = sadd.s32 1, %s841_s19  ;;  %s845_s20 = sphi %s883_s20, %s21_s20   ;;  %s841_s19 = sphi %s881_s19, %s1015_s19   ;;  %s837_s18 = sphi %s879_s18, %s1014_s18   ;;  %s833_s17 = sphi %s877_s17, %s1013_s17   ;;  %s829_s16 = sphi %s875_s16, %s1012_s16   ;;  %s825_s15 = sphi %s873_s15, %s1011_s15  }
   0x7   : > { %p35_p0 = scmp.ge.s32.totalorder %s33_s22, 2  ;;  %s42_s23 = sadd.s32 1, %s833_s17 }
   0x8   : > { %p49_p1 = scmp.ne.s32.totalorder %s833_s17, %s829_s16  ;;  %p50_p2 = scmp.eq.s32.totalorder %s845_s20, 0 }
   0x9   : > { %s1017_s22 = smov (%p35_p0, %s33_s22), 0  ;;  %p55_p4 = scmp.ne.s32.totalorder %s829_s16, %s825_s15 }
   0xa   : > { %p909_p3 = por %p50_p2, %p49_p1  ;;  %s37_s25 = ssub.s32 %s841_s19, %s1017_s22 }
   0xb   : > { %p56_p5 = scmp.eq.s32.totalorder %s644_s21, 0  ;;  %p40_p6 = scmp.eq.s32.totalorder %s37_s25, 0 }
   0xc   : > { %p675_p8 = scmp.lt.s32.totalorder %s845_s20, 2  ;;  %s191_s28 = sand.u32 1, %s833_s17  }
   0xd   : > { %p916_p7 = por %p56_p5, %p55_p4  ;;  %s663_s29 = sshll.u32 %s841_s19, 3 }
   0xe   : > { %s922_s27 = scalar_select %p40_p6, %s833_s17, %s42_s23  }
   0xf   : > { %s648_s30 = sshll.u32 %s191_s28, 3  ;;  %s202_s7 = scalar_lea.hbm %s1003_s0, %s663_s29 }
  0x10   : > { %s204_s8 = sshll.u32 %s202_s7, 4  ;;  %s195_s9 = scalar_lea.vmem [#allocation2], %s648_s30  ;;  %s205_s8 = int_to_ptr.hbm [resolvable:$true] %s204_s8 }
  0x11   : > { %s206_s10 = sshll.u32 %s195_s9, 4  ;;  %p931_p9 = pnand %p675_p8, %p909_p3  ;;  %s207_s10 = int_to_ptr.vmem [resolvable:$true] %s206_s10 }
  0x12   : > { %p653_p10 = scmp.ge.s32.totalorder %s845_s20, 1  ;;  %p232_p11 = scmp.lt.s32.totalorder %s845_s20, 3 }
  0x13   : > { %s651_s12 = sshll.u32 %s191_s28, 1  ;;  %s192_s13 = scalar_lea.sflag [#allocation3], %s191_s28 }
  0x14   : > { %671 = dma.hbm_to_vmem [thread:$0]  (!%p931_p9), %s205_s8, 128, %s207_s10, %s192_s13  }
  0x15   : > { %p233_p12 = pnand %p653_p10, %p232_p11  ;;  %s652_s14 = sshll.u32 %s841_s19, 1 }
  0x16   : > { %s217_s15 = scalar_lea.vmem [#allocation4], %s651_s12  ;;  %s223_s24 = scalar_lea.hbm %s1004_s1, %s652_s14 }
  0x17   : > { %s227_s21 = sshll.u32 %s217_s15, 4  ;;  %s225_s29 = sshll.u32 %s223_s24, 4  ;;  %s228_s21 = int_to_ptr.vmem [resolvable:$true] %s227_s21  ;;  %s226_s29 = int_to_ptr.hbm [resolvable:$true] %s225_s29 }
  0x18   : > { %s214_s30 = scalar_lea.sflag [#allocation5], %s191_s28  ;;  %236 = sbr.rel (%p233_p12) target bundleno = 251 (0xfb), region = 28 }
  0x19   : > { %674 = dma.hbm_to_vmem [thread:$0]  (!%p931_p9), %s226_s29, 32, %s228_s21, %s214_s30  }
  0x1a   : > { %s238_s5 = sand.u32 (!%p233_p12), 1, %s829_s16  }
  0x1b   : > { %s654_s6 = sshll.u32 (!%p233_p12), %s238_s5, 3  ;;  %s239_s7 = scalar_lea.sflag (!%p233_p12), [#allocation3], %s238_s5 }
  0x1c   : > { %s242_s8 = scalar_lea.vmem (!%p233_p12), [#allocation2], %s654_s6 }
  0x1d   : > { %816 = dma.done.wait (%p916_p7), %s239_s7, 128  }
  0x1e   : > { %818 = vsyncadd (%p916_p7), %s239_s7, 4294967168  ;;  %s655_s9 = sshll.u32 %s238_s5, 1  ;;  %s249_s10 = scalar_lea.sflag [#allocation5], %s238_s5 }
  0x1f   : > { %s252_s12 = scalar_lea.vmem [#allocation4], %s655_s9 }
  0x20   : > { %820 = dma.done.wait (%p916_p7), %s249_s10, 32  }
  0x21   : > { %822 = vsyncadd (%p916_p7), %s249_s10, 4294967264  ;;  %v409_v0 = vlaneseq  ;;  %v323_v2 = vld [vmem:[%s252_s12] sm:$0x3]  ;;  %v322_v3 = vld [vmem:[%s242_s8] sm:$0xff]  ;;  %vm330_vm2 = vcmask 1043456   ;;  %v847_v6 = vmov 0.0  }
  0x22   : > { %v411_v4 = vperm.slane %v323_v2, 0  ;;  %v412_v5 = vperm.slane %v323_v2, 1  ;;  %325 = vst [vmem:[#allocation1] ss:$2 sm:$0xff] %v322_v3  ;;  %p301_p13 = scmp.lt.s32.totalorder %s837_s18, 1  ;;  %vm424_vm11 = vcmask 3072  }
  0x23   : > { %v410_v1 = vshrl.u32 %v409_v0, 7 }
  0x24   : > { %s1019_s18 = smov (!%p301_p13, %s837_s18), 1 }
  0x25   : > { %vm413_vm0 = vcmp.eq.s32.totalorder %v411_v4, %v410_v1  ;;  %vm414_vm1 = vcmp.eq.s32.totalorder %v412_v5, %v410_v1  ;;  %s656_s26 = sshll.u32 %s1019_s18, 2 }
  0x26   : > { %v954_v7 = vsel %vm413_vm0, 1.0, %v847_v6  ;;  %v956_v8 = vsel %vm414_vm1, 1.0, %v847_v6  ;;  %s307_s13 = scalar_lea.vmem %s1005_s2, %s656_s26  ;;  %s314_s21 = scalar_lea.vmem %s1006_s3, %s656_s26 }
  0x27   : > { %v419_v9 = vsel %vm330_vm2, %v954_v7, 0.0  ;;  %v420_v10 = vsel %vm330_vm2, %v956_v8, 0.0  ;;  %s321_s24 = scalar_lea.vmem %s1007_s4, %s656_s26 }
  0x28   : > { %v421_v11 = vadd.f32 %v420_v10, %v419_v9 }
  0x29   : > { %v326_v12 = vld.sshfl [vmem:[#allocation1] sm:$0xff pattern:$0x75316420]  ;;  %v327_v13 = vld.sshfl [vmem:[#allocation1 + $0x8] sm:$0xff pattern:$0x75316420] }
  0x2a   : > { %422 = vadd.xlane.f32.xlu0 %v421_v11  ;;  %v331_v14 = vsel %vm330_vm2, %v326_v12, -inf  ;;  %v338_v15 = vsel %vm330_vm2, %v327_v13, -inf }
  0x2b   : > { %v332_v16 = vrot.slane %v331_v14, 4  ;;  %v339_v17 = vrot.slane %v338_v15, 4 }
  0x2d   : > { %v333_v18 = vmax.f32 %v331_v14, %v332_v16  ;;  %v340_v19 = vmax.f32 %v338_v15, %v339_v17 }
  0x2f   : > { %v334_v20 = vrot.slane %v333_v18, 2  ;;  %v341_v21 = vrot.slane %v340_v19, 2 }
  0x31   : > { %v335_v22 = vmax.f32 %v333_v18, %v334_v20  ;;  %v342_v23 = vmax.f32 %v340_v19, %v341_v21 }
  0x33   : > { %v336_v24 = vrot.slane %v335_v22, 1  ;;  %v343_v25 = vrot.slane %v342_v23, 1 }
  0x35   : > { %v337_v26 = vmax.f32 %v335_v22, %v336_v24  ;;  %v344_v27 = vmax.f32 %v342_v23, %v343_v25 }
  0x37   : > { %v347_v28 = vrot.slane %v344_v27, 4 }
  0x39   : > { %v348_v29 = vsel %vm330_vm2, %v337_v26, %v347_v28 }
  0x3a   : > { %v350_v30 = vsub.f32 %v322_v3, %v348_v29 }
  0x3c   : > { %v351_v31 = vmul.f32 1.442695, %v350_v30 }
  0x3e   : > { %725 = vpow2.f32 %v351_v31 }
  0x44   : > { %v726_v32 = vpop.eup %725 }
  0x45   : > { %354 = vst [vmem:[#allocation1] ss:$2 sm:$0xff] %v726_v32 }
  0x4c   : > { %v355_v33 = vld.sshfl [vmem:[#allocation1] sm:$0xff pattern:$0x75316420]  ;;  %v356_v34 = vld.sshfl [vmem:[#allocation1 + $0x8] sm:$0xff pattern:$0x75316420] }
  0x4d   : > { %v359_v35 = vsel %vm330_vm2, %v355_v33, 0.0  ;;  %v366_v36 = vsel %vm330_vm2, %v356_v34, 0.0 }
  0x4e   : > { %v360_v37 = vrot.slane %v359_v35, 4  ;;  %v367_v38 = vrot.slane %v366_v36, 4 }
  0x50   : > { %v361_v39 = vadd.f32 %v360_v37, %v359_v35  ;;  %v368_v40 = vadd.f32 %v367_v38, %v366_v36 }
  0x52   : > { %v362_v41 = vrot.slane %v361_v39, 2  ;;  %v369_v42 = vrot.slane %v368_v40, 2 }
  0x54   : > { %v363_v43 = vadd.f32 %v362_v41, %v361_v39  ;;  %v370_v44 = vadd.f32 %v369_v42, %v368_v40 }
  0x56   : > { %v364_v45 = vrot.slane %v363_v43, 1  ;;  %v371_v46 = vrot.slane %v370_v44, 1 }
  0x58   : > { %v365_v47 = vadd.f32 %v364_v45, %v363_v43  ;;  %v372_v48 = vadd.f32 %v371_v46, %v370_v44 }
  0x5a   : > { %727 = vrcp.f32 %v365_v47  ;;  %vm378_vm3 = vweird.f32 %v365_v47  ;;  %v382_v52 = vand.u32 2147483647, %v365_v47  ;;  %v384_v55 = vand.u32 2147483648, %v365_v47 }
  0x5b   : > { %729 = vrcp.f32 %v372_v48  ;;  %v399_v56 = vand.u32 2147483648, %v372_v48  ;;  %vm393_vm5 = vweird.f32 %v372_v48  ;;  %v397_v58 = vand.u32 2147483647, %v372_v48 }
  0x5c   : > { %v385_v62 = vor.u32 1.1754944e-38, %v384_v55  ;;  %vm383_vm9 = vcmp.eq.f32.partialorder %v382_v52, 8.507059e+37 }
  0x5d   : > { %v400_v63 = vor.u32 1.1754944e-38, %v399_v56  ;;  %vm398_vm10 = vcmp.eq.f32.partialorder %v397_v58, 8.507059e+37 }
  0x60   : > { %v728_v49 = vpop.eup %727 }
  0x61   : > { %v730_v50 = vpop.eup %729  ;;  %v374_v51 = vmul.f32 %v728_v49, %v365_v47  ;;  %vm379_vm4 = vweird.f32 %v728_v49 }
  0x62   : > { %v389_v53 = vmul.f32 %v730_v50, %v372_v48  ;;  %vm394_vm6 = vweird.f32 %v730_v50  ;;  %vm380_vm7 = vmor %vm378_vm3, %vm379_vm4 }
  0x63   : > { %v375_v54 = vsub.f32 1.0, %v374_v51  ;;  %vm395_vm8 = vmor %vm393_vm5, %vm394_vm6 }
  0x64   : > { %v390_v57 = vsub.f32 1.0, %v389_v53 }
  0x65   : > { %v376_v59 = vmul.f32 %v728_v49, %v375_v54 }
  0x66   : > { %v391_v60 = vmul.f32 %v730_v50, %v390_v57 }
  0x67   : > { %v377_v61 = vadd.f32 %v728_v49, %v376_v59 }
  0x68   : > { %v392_v0 = vadd.f32 %v730_v50, %v391_v60 }
  0x69   : > { %v381_v1 = vsel %vm380_vm7, %v728_v49, %v377_v61 }
  0x6a   : > { %v396_v2 = vsel %vm395_vm8, %v730_v50, %v392_v0  ;;  %v386_v3 = vsel %vm383_vm9, %v385_v62, %v381_v1 }
  0x6b   : > { %v401_v4 = vsel %vm398_vm10, %v400_v63, %v396_v2 }
  0x6c   : > { %v405_v5 = vrot.slane %v401_v4, 4 }
  0x6e   : > { %v406_v6 = vsel %vm330_vm2, %v386_v3, %v405_v5 }
  0x6f   : > { %v408_v9 = vmul.f32 %v726_v32, %v406_v6 }
  0x71   : > { %427 = vst [vmem:[#allocation1] ss:$2 sm:$0xff] %v408_v9 }
  0x78   : > { %v428_v10 = vld.sshfl [vmem:[#allocation1] sm:$0xff pattern:$0x75316420]  ;;  %v429_v11 = vld.sshfl [vmem:[#allocation1 + $0x8] sm:$0xff pattern:$0x75316420] }
  0x79   : > { %438 = vst [vmem:[#allocation1] ss:$2 sm:$0xff] %v408_v9  ;;  %v432_v12 = vsel %vm330_vm2, %v428_v10, 0.0  ;;  %v433_v13 = vsel %vm330_vm2, %v429_v11, 0.0 }
  0x7a   : > { %v434_v14 = vadd.f32 %v433_v13, %v432_v12 }
  0x7c   : > { %435 = vadd.xlane.f32.xlu0 %v434_v14 }
  0x80   : > { %v439_v15 = vld.sshfl [vmem:[#allocation1] sm:$0xff pattern:$0x75316420]  ;;  %v440_v16 = vld.sshfl [vmem:[#allocation1 + $0x8] sm:$0xff pattern:$0x75316420] }
  0x81   : > { %v443_v17 = vmul.f32 %v954_v7, %v439_v15  ;;  %v444_v18 = vmul.f32 %v956_v8, %v440_v16 }
  0x83   : > { %v445_v19 = vsel %vm330_vm2, %v443_v17, 0.0  ;;  %v446_v20 = vsel %vm330_vm2, %v444_v18, 0.0 }
  0x84   : > { %v447_v21 = vadd.f32 %v446_v20, %v445_v19 }
  0x86   : > { %448 = vadd.xlane.f32.xlu1 %v447_v21 }
  0x9d   : > { %v423_v22 = vpop.xlane.xlu0 %422 }
  0x9e   : > { %425 = vst.msk [vmem:[%s307_s13] sm:$0xf] %vm424_vm11, %v423_v22 }
  0xef   : > { %v436_v7 = vpop.xlane.xlu0 %435 }
  0xf0   : > { %437 = vst.msk [vmem:[%s314_s21] sm:$0xf] %vm424_vm11, %v436_v7 }
  0xf9   : > { %v449_v8 = vpop.xlane.xlu1 %448 }
  0xfa   : > { %450 = vst.msk [vmem:[%s321_s24] sm:$0xf] %vm424_vm11, %v449_v8 }
  0xfb PF: > { %s21_s20 = sadd.s32 1, %s845_s20   ;;  %s1011_s15 = smov %s829_s16 }
  0xfc   : > { %p18_p0 = scmp.ge.s32.totalorder %s21_s20, 4   ;;  %s1012_s16 = smov %s833_s17 }
  0xfd   : > { %s1013_s17 = smov %s922_s27  ;;  %s1014_s18 = smov %s841_s19 }
  0xfe   : > { %s1015_s19 = smov %s1017_s22  ;;  %20 = sbr.rel (!%p18_p0) target bundleno = 6 (0x6), region = 105 }
 0x103   :  { %516 = vsyncpa [#allocation3], 1 }
 0x104   :  { %518 = vsyncpa [#allocation3 + $0x1], 1 }
 0x105   :  { %519 = vsyncpa [#allocation5], 1 }
 0x106   :  { %521 = vsyncpa [#allocation5 + $0x1], 1 }

</bundles_post_ra>
